<compile_context>
chip_gen: v5e
topology: v5e:2x2
jax: 0.10.0
libtpu: 0.0.40
codegen_flags: <defaults>
</compile_context>

<pallas_src>
import functools

import jax
import jax.numpy as jnp
import numpy as np
from jax.experimental import pallas as pl
from jax.experimental.pallas import tpu as pltpu


def _se_kernel_pool1(x_ref, w1e_ref, b1e_ref, w2e_ref, b2e_ref, o_ref):
    """pool == 1 fast path.  x_ref / o_ref are lane-dense (rows, H*W) blocks.

    The per-window FC (Linear -> ReLU -> Linear -> h_sigmoid over each
    length-W window of a row) is applied via block-diagonal expanded weights,
    so there is no in-kernel reshape/relayout and the gate comes out already
    in (rows, H*W) layout for the elementwise multiply with xb.
    """
    xb = x_ref[...]                                          # (rows, H*W), input dtype
    # First FC: xb stays in its native dtype (bf16 feeds the MXU directly);
    # accumulation is f32 via preferred_element_type.
    h = jnp.dot(xb, w1e_ref[...], preferred_element_type=jnp.float32)
    h = jnp.maximum(h + b1e_ref[...], 0.0)                   # + bias, ReLU
    s = jnp.dot(h, w2e_ref[...], preferred_element_type=jnp.float32)
    s = s + b2e_ref[...]
    gate = (jnp.clip(s + 3.0, 0.0, 6.0) * (1.0 / 6.0)).astype(xb.dtype)  # h_sigmoid
    o_ref[...] = (xb * gate).astype(o_ref.dtype)


def _se_kernel_pool_n(x_ref, w1t_ref, b1_ref, w2t_ref, b2_ref, o_ref, *, H, W, pool):
    """General pool > 1 path (degenerate under the module's broadcast rules)."""
    xb = x_ref[...]                                          # (rows, H*W)
    n_rows = xb.shape[0]
    Hp, Wp = H - pool + 1, W - pool + 1
    c_out = w2t_ref.shape[-1]
    x3 = xb.reshape(n_rows, H, W)
    # TODO(synk): replace the unaligned window slices with pltpu.roll shifts in
    # the flat lane-dense layout (XLU slot) to avoid per-slice relayout copies.
    acc = x3[:, :Hp, :Wp].astype(jnp.float32)
    for di in range(pool):
        for dj in range(pool):
            if di == 0 and dj == 0:
                continue
            acc = acc + x3[:, di:di + Hp, dj:dj + Wp].astype(jnp.float32)
    y2 = (acc * (1.0 / float(pool * pool))).reshape(n_rows * Hp, Wp)
    h = jnp.dot(y2, w1t_ref[...], preferred_element_type=jnp.float32) + b1_ref[...]
    h = jnp.maximum(h, 0.0)
    s = jnp.dot(h, w2t_ref[...], preferred_element_type=jnp.float32) + b2_ref[...]
    s = jnp.clip(s + 3.0, 0.0, 6.0) * (1.0 / 6.0)
    gate = s.reshape(n_rows, Hp, c_out).astype(xb.dtype)
    o_ref[...] = (x3 * gate).reshape(n_rows, H * W).astype(o_ref.dtype)


def _pick_batch_tile(B, C, bytes_per_batch):
    """Pick the batch tile.

    Constraints / preferences:
      * divides B and keeps rows = batch_tile*C a multiple of 8 (legal (8,128)
        tiling without padding),
      * targets ~4 MiB xb blocks (HBM-bound kernel: big blocks amortize the
        ~0.35us/step overhead, but 2x double-buffered in+out blocks plus f32
        intermediates must stay well inside v7x's 64 MiB VMEM),
      * leaves >= 2 grid steps whenever B allows it so the "parallel" batch
        axis can be sharded across v7x's two TensorCores.
    """
    divs = [d for d in range(1, B + 1) if B % d == 0 and (d * C) % 8 == 0]
    if not divs:
        # No legal divisor: block == full array dims is always legal.
        # TODO(synk): pad rows to a multiple of 8 instead of falling back.
        return B
    target = max(1, (4 * 1024 * 1024) // max(bytes_per_batch, 1))
    ok = [d for d in divs if d <= target and B // d >= 2]
    if ok:
        return max(ok)
    ok = [d for d in divs if d <= target]
    if ok:
        return max(ok)
    return min(divs)


def se_layer(x, w1, b1, w2, b2, *, pool, batch_tile=None):
    B, C, H, W = x.shape
    Hp, Wp = H - pool + 1, W - pool + 1
    c_red = w1.shape[0]
    c_out = w2.shape[0]
    HW = H * W
    # Same shape constraints PyTorch would enforce at runtime.
    assert w1.shape == (c_red, C) and Wp == C, "Linear in_features must match last dim"
    assert w2.shape == (c_out, c_red) and c_out == C
    assert Hp in (H, 1) and (c_out == W or c_out == 1), "x * y broadcast invalid"

    if batch_tile is None:
        batch_tile = _pick_batch_tile(B, C, C * HW * x.dtype.itemsize)
    assert B % batch_tile == 0
    n_steps = B // batch_tile
    rows = batch_tile * C

    # Lane-dense 2D view: last dim is H*W.
    x2d = x.reshape(B * C, HW)

    # Explicit scoped-VMEM budget: 2x double-buffered (in + out) blocks plus
    # f32 intermediates (s / gate) plus slack; floor 32 MiB (lifts the v5e
    # 16 MiB default), cap 48 MiB (inside v7x's 64 MiB physical VMEM).
    block_bytes = rows * HW * x.dtype.itemsize
    vmem_limit = int(min(max(4 * block_bytes + 3 * rows * HW * 4 + (8 << 20),
                             32 << 20), 48 << 20))
    cparams = pltpu.CompilerParams(
        dimension_semantics=("parallel",), vmem_limit_bytes=vmem_limit)

    if pool == 1:
        # Block-diagonal expanded weights (host-side, one-time):
        #   W1e[h*W:(h+1)*W, h*c_red:(h+1)*c_red] = w1.T   -> (H*W, H*c_red)
        #   W2e[h*c_red:(h+1)*c_red, h*W:(h+1)*W] = w2.T   -> (H*c_red, H*W)
        eye = jnp.eye(H, dtype=jnp.float32)
        w1e = jnp.einsum("gh,rc->grhc", eye, w1.astype(jnp.float32).T
                         ).reshape(H * C, H * c_red).astype(x.dtype)
        w2e = jnp.einsum("gh,rc->grhc", eye, w2.astype(jnp.float32).T
                         ).reshape(H * c_red, H * c_out).astype(jnp.float32)
        b1e = jnp.tile(b1.astype(jnp.float32).reshape(1, c_red), (1, H))
        b2e = jnp.tile(b2.astype(jnp.float32).reshape(1, c_out), (1, H))

        out2d = pl.pallas_call(
            _se_kernel_pool1,
            out_shape=jax.ShapeDtypeStruct((B * C, HW), x.dtype),
            grid=(n_steps,),
            in_specs=[
                pl.BlockSpec((rows, HW), lambda i: (i, 0)),
                pl.BlockSpec((H * C, H * c_red), lambda i: (0, 0)),
                pl.BlockSpec((1, H * c_red), lambda i: (0, 0)),
                pl.BlockSpec((H * c_red, H * c_out), lambda i: (0, 0)),
                pl.BlockSpec((1, H * c_out), lambda i: (0, 0)),
            ],
            out_specs=pl.BlockSpec((rows, HW), lambda i: (i, 0)),
            compiler_params=cparams,
        )(x2d, w1e, b1e, w2e, b2e)
    else:
        # Degenerate (pool > 1) path: plain transposed weights.
        w1t = w1.astype(jnp.float32).T                       # (C, c_red)
        w2t = w2.astype(jnp.float32).T                       # (c_red, C)
        b1_2d = b1.astype(jnp.float32).reshape(1, c_red)
        b2_2d = b2.astype(jnp.float32).reshape(1, c_out)
        kernel = functools.partial(_se_kernel_pool_n, H=H, W=W, pool=pool)
        out2d = pl.pallas_call(
            kernel,
            out_shape=jax.ShapeDtypeStruct((B * C, HW), x.dtype),
            grid=(n_steps,),
            in_specs=[
                pl.BlockSpec((rows, HW), lambda i: (i, 0)),
                pl.BlockSpec((C, c_red), lambda i: (0, 0)),
                pl.BlockSpec((1, c_red), lambda i: (0, 0)),
                pl.BlockSpec((c_red, c_out), lambda i: (0, 0)),
                pl.BlockSpec((1, c_out), lambda i: (0, 0)),
            ],
            out_specs=pl.BlockSpec((rows, HW), lambda i: (i, 0)),
            compiler_params=cparams,
        )(x2d, w1t, b1_2d, w2t, b2_2d)

    return out2d.reshape(B, C, H, W)


def _reference(x, w1, b1, w2, b2, pool):
    # Pure-JAX reference with identical semantics.
    B, C, H, W = x.shape
    Hp, Wp = H - pool + 1, W - pool + 1
    acc = jnp.zeros((B, C, Hp, Wp), jnp.float32)
    for di in range(pool):
        for dj in range(pool):
            acc = acc + x[:, :, di:di + Hp, dj:dj + Wp].astype(jnp.float32)
    y = acc / float(pool * pool)
    h = jnp.maximum(jnp.einsum("bchw,rw->bchr", y, w1) + b1, 0.0)
    s = jnp.einsum("bchr,kr->bchk", h, w2) + b2              # h @ w2.T
    s = jnp.clip(s + 3.0, 0.0, 6.0) / 6.0
    return (x * s).astype(x.dtype)


if __name__ == "__main__":
    # Small shapes consistent with the module's constraints:
    # channel=16, reduction=4, pool=1, spatial H=8, W=16 (W == channel).
    B, C, H, W = 2, 16, 8, 16
    pool, reduction = 1, 4
    c_red = C // reduction

    key = jax.random.PRNGKey(0)
    kx, k1, k2, k3, k4 = jax.random.split(key, 5)
    x = jax.random.normal(kx, (B, C, H, W), dtype=jnp.float32)
    w1 = jax.random.normal(k1, (c_red, C), dtype=jnp.float32) * 0.1
    b1 = jax.random.normal(k2, (c_red,), dtype=jnp.float32) * 0.1
    w2 = jax.random.normal(k3, (C, c_red), dtype=jnp.float32) * 0.1
    b2 = jax.random.normal(k4, (C,), dtype=jnp.float32) * 0.1

    out = se_layer(x, w1, b1, w2, b2, pool=pool)
    out = jax.block_until_ready(out)

    ref = _reference(x, w1, b1, w2, b2, pool)
    # Tolerance allows for TPU default (bf16-pass) matmul precision differences
    # between the Pallas dots and the XLA einsum in the reference, plus the
    # extra zero-FLOP terms in the block-diagonal contraction.
    np.testing.assert_allclose(np.asarray(out), np.asarray(ref), rtol=1e-3, atol=1e-3)

    print("KERNEL_OK")
</pallas_src>

<mosaic_0001>
module attributes {stable_mosaic.version = 11 : i64} {
  func.func @_se_kernel_pool1(%arg0: i32, %arg1: memref<16x128xf32, #tpu.memory_space<vmem>>, %arg2: memref<128x32xf32, #tpu.memory_space<vmem>>, %arg3: memref<1x32xf32, #tpu.memory_space<vmem>>, %arg4: memref<32x128xf32, #tpu.memory_space<vmem>>, %arg5: memref<1x128xf32, #tpu.memory_space<vmem>>, %arg6: memref<16x128xf32, #tpu.memory_space<vmem>>) attributes {dimension_semantics = [#tpu.dimension_semantics<parallel>], iteration_bounds = array<i64: 2>, scalar_prefetch = 0 : i64, scratch_operands = 0 : i64, tpu.core_type = #tpu.core_type<tc>, window_params = [{transform_indices = @transform_0, window_bounds = array<i64: 16, 128>}, {pipeline_mode = #tpu.pipeline_mode<synchronous>, transform_indices = @transform_1, window_bounds = array<i64: 128, 32>}, {pipeline_mode = #tpu.pipeline_mode<synchronous>, transform_indices = @transform_2, window_bounds = array<i64: 1, 32>}, {pipeline_mode = #tpu.pipeline_mode<synchronous>, transform_indices = @transform_3, window_bounds = array<i64: 32, 128>}, {pipeline_mode = #tpu.pipeline_mode<synchronous>, transform_indices = @transform_4, window_bounds = array<i64: 1, 128>}, {transform_indices = @transform_5, window_bounds = array<i64: 16, 128>}]} {
    %c0 = arith.constant 0 : index
    %c0_0 = arith.constant 0 : index
    %0 = vector.load %arg1[%c0, %c0_0] : memref<16x128xf32, #tpu.memory_space<vmem>>, vector<16x128xf32>
    %c0_1 = arith.constant 0 : index
    %c0_2 = arith.constant 0 : index
    %1 = vector.load %arg2[%c0_1, %c0_2] : memref<128x32xf32, #tpu.memory_space<vmem>>, vector<128x32xf32>
    %cst = arith.constant dense<0.000000e+00> : vector<16x32xf32>
    %2 = tpu.matmul %0, %1, %cst {dimension_numbers = #tpu.dot_dimension_numbers<[1], [0], [0], [1], [0, 0, 1, 1], [], []>} : vector<16x128xf32>, vector<128x32xf32>, vector<16x32xf32> -> vector<16x32xf32>
    %c0_3 = arith.constant 0 : index
    %c0_4 = arith.constant 0 : index
    %3 = vector.load %arg3[%c0_3, %c0_4] : memref<1x32xf32, #tpu.memory_space<vmem>>, vector<1x32xf32>
    %4 = vector.broadcast %3 : vector<1x32xf32> to vector<16x32xf32>
    %5 = arith.addf %2, %4 : vector<16x32xf32>
    %cst_5 = arith.constant 0.000000e+00 : f32
    %6 = vector.broadcast %cst_5 : f32 to vector<16x32xf32>
    %7 = arith.maximumf %5, %6 : vector<16x32xf32>
    %c0_6 = arith.constant 0 : index
    %c0_7 = arith.constant 0 : index
    %8 = vector.load %arg4[%c0_6, %c0_7] : memref<32x128xf32, #tpu.memory_space<vmem>>, vector<32x128xf32>
    %cst_8 = arith.constant dense<0.000000e+00> : vector<16x128xf32>
    %9 = tpu.matmul %7, %8, %cst_8 {dimension_numbers = #tpu.dot_dimension_numbers<[1], [0], [0], [1], [0, 0, 1, 1], [], []>} : vector<16x32xf32>, vector<32x128xf32>, vector<16x128xf32> -> vector<16x128xf32>
    %c0_9 = arith.constant 0 : index
    %c0_10 = arith.constant 0 : index
    %10 = vector.load %arg5[%c0_9, %c0_10] : memref<1x128xf32, #tpu.memory_space<vmem>>, vector<1x128xf32>
    %11 = vector.broadcast %10 : vector<1x128xf32> to vector<16x128xf32>
    %12 = arith.addf %9, %11 : vector<16x128xf32>
    %cst_11 = arith.constant 3.000000e+00 : f32
    %13 = vector.broadcast %cst_11 : f32 to vector<16x128xf32>
    %14 = arith.addf %12, %13 : vector<16x128xf32>
    %cst_12 = arith.constant 0.000000e+00 : f32
    %cst_13 = arith.constant 6.000000e+00 : f32
    %15 = vector.broadcast %cst_12 : f32 to vector<16x128xf32>
    %16 = arith.maximumf %15, %14 : vector<16x128xf32>
    %17 = vector.broadcast %cst_13 : f32 to vector<16x128xf32>
    %18 = arith.minimumf %17, %16 : vector<16x128xf32>
    %cst_14 = arith.constant 0.166666672 : f32
    %19 = vector.broadcast %cst_14 : f32 to vector<16x128xf32>
    %20 = arith.mulf %18, %19 : vector<16x128xf32>
    %21 = arith.mulf %0, %20 : vector<16x128xf32>
    %c0_15 = arith.constant 0 : index
    %c0_16 = arith.constant 0 : index
    %22 = vector.load %arg6[%c0_15, %c0_16] : memref<16x128xf32, #tpu.memory_space<vmem>>, vector<16x128xf32>
    tpu.vector_store %arg6[%c0_15, %c0_16], %21 {strides = array<i32>} : memref<16x128xf32, #tpu.memory_space<vmem>>, vector<16x128xf32>,
    return
  }
  func.func @transform_0(%arg0: i32) -> (i32, i32) {
    %c0_i32 = arith.constant 0 : i32
    %c0_i32_0 = arith.constant 0 : i32
    return %arg0, %c0_i32 : i32, i32
  }
  func.func @transform_1(%arg0: i32) -> (i32, i32) {
    %c0_i32 = arith.constant 0 : i32
    %c0_i32_0 = arith.constant 0 : i32
    %c0_i32_1 = arith.constant 0 : i32
    return %c0_i32, %c0_i32_0 : i32, i32
  }
  func.func @transform_2(%arg0: i32) -> (i32, i32) {
    %c0_i32 = arith.constant 0 : i32
    %c0_i32_0 = arith.constant 0 : i32
    %c0_i32_1 = arith.constant 0 : i32
    return %c0_i32, %c0_i32_0 : i32, i32
  }
  func.func @transform_3(%arg0: i32) -> (i32, i32) {
    %c0_i32 = arith.constant 0 : i32
    %c0_i32_0 = arith.constant 0 : i32
    %c0_i32_1 = arith.constant 0 : i32
    return %c0_i32, %c0_i32_0 : i32, i32
  }
  func.func @transform_4(%arg0: i32) -> (i32, i32) {
    %c0_i32 = arith.constant 0 : i32
    %c0_i32_0 = arith.constant 0 : i32
    %c0_i32_1 = arith.constant 0 : i32
    return %c0_i32, %c0_i32_0 : i32, i32
  }
  func.func @transform_5(%arg0: i32) -> (i32, i32) {
    %c0_i32 = arith.constant 0 : i32
    %c0_i32_0 = arith.constant 0 : i32
    return %arg0, %c0_i32 : i32, i32
  }
}

</mosaic_0001>

<bundles_post_ra>
// kernel: tpu_custom_call.1
= control target key start
LH: loop header
LB: loop body
LE: loop exit
PB: predicated region body
PF: predicated region fallthrough
CT: control target
= control target key end

     0   :  { %10 = vsyncpa [#allocation3], 0  ;;  %s721_s0 = inlined_call_operand.vmem [shape: f32[32,128], index: 0, kind: input, shape index: {}]   ;;  %s722_s1 = inlined_call_operand.vmem [shape: f32[128,32], index: 1, kind: input, shape index: {}]   ;;  %s723_s2 = inlined_call_operand.vmem [shape: f32[1,32], index: 2, kind: input, shape index: {}]   ;;  %s724_s3 = inlined_call_operand.vmem [shape: f32[32,128], index: 3, kind: input, shape index: {}]   ;;  %s725_s4 = inlined_call_operand.vmem [shape: f32[1,128], index: 4, kind: input, shape index: {}]   ;;  %s726_s5 = inlined_call_operand.hbm [shape: f32[32,128], index: 5, kind: output, shape index: {}]  }
   0x1   :  { %12 = vsyncpa [#allocation3 + $0x1], 0  ;;  %s571_s18 = smov 0   ;;  %s573_s19 = smov 0  }
   0x2   :  { %s575_s20 = smov 0   ;;  %s577_s21 = smov 0  }
   0x3 LB: > { %s592_s22 = sadd.s32 4294967295, %s537_s21   ;;  %s401_s23 = sadd.s32 4294967294, %s537_s21   ;;  %s537_s21 = sphi %s577_s21, %s732_s21   ;;  %s533_s20 = sphi %s575_s20, %s731_s20   ;;  %s529_s19 = sphi %s573_s19, %s730_s19   ;;  %s525_s18 = sphi %s571_s18, %s729_s18  }
   0x4   : > { %s596_s24 = sadd.s32 1, %s537_s21   ;;  %s135_s25 = sadd.s32 1, %s533_s20 }
   0x5   : > { %s132_s26 = ssub.s32 %s537_s21, %s596_s24  ;;  %p145_p0 = scmp.ne.s32.totalorder %s533_s20, %s529_s19 }
   0x6   : > { %p133_p1 = scmp.eq.s32.totalorder %s132_s26, 0  ;;  %p146_p2 = scmp.eq.s32.totalorder %s592_s22, 1 }
   0x7   : > { %p151_p3 = scmp.ne.s32.totalorder %s529_s19, %s525_s18  ;;  %p152_p4 = scmp.eq.s32.totalorder %s401_s23, 1 }
   0x8   : > { %s607_s27 = scalar_select %p133_p1, %s533_s20, %s135_s25  }
   0x9   : > { %p609_p5 = por %p146_p2, %p145_p0  ;;  %p613_p6 = por %p152_p4, %p151_p3 }
   0xa   : > { %p404_p7 = scmp.ge.s32.totalorder %s537_s21, 1  ;;  %p191_p8 = scmp.lt.s32.totalorder %s537_s21, 3 }
   0xc   : > { %p192_p9 = pnand %p404_p7, %p191_p8 }
   0xd   : > { %s406_s7 = sshll.u32 (!%p192_p9), %s592_s22, 1  ;;  %s216_s6 = sand.u32 (!%p192_p9), 1, %s529_s19  }
   0xe   : > { %195 = sbr.rel (%p192_p9) target bundleno = 331 (0x14b), region = 40  ;;  %p220_p10 = scmp.lt.s32.totalorder (!%p192_p9), %s406_s7, 3 }
   0xf   : > { %s405_s8 = sshll.u32 (!%p192_p9), %s216_s6, 4  ;;  %s415_s9 = sshll.u32 (!%p192_p9), %s592_s22, 4 }
  0x10   : > { %s335_s12 = scalar_lea.hbm (!%p192_p9), %s726_s5, %s415_s9  ;;  %s324_s15 = scalar_lea.sflag (!%p192_p9), [#allocation3], %s216_s6 }
  0x11   : > { %s338_s14 = sshll.u32 (!%p192_p9), %s335_s12, 4  ;;  %s495_s25 = scalar_lea.hbm (!%p192_p9), %s726_s5, 32  ;;  %s339_s14 = int_to_ptr.hbm [resolvable:$true] %s338_s14 }
  0x12   : > { %s489_s22 = sshra.s32 (!%p192_p9), %s339_s14, 4  ;;  %s490_s22 = int_to_ptr.hbm [resolvable:$true] %s489_s22 }
  0x13   : > { %v243_v0 = vld [vmem:[%s722_s1 + $0x78] sm:$0xff]  ;;  %v242_v1 = vld [vmem:[%s722_s1 + $0x70] sm:$0xff]  ;;  %v241_v2 = vld [vmem:[%s722_s1 + $0x68] sm:$0xff]  ;;  %s734_s7 = smov (!%p220_p10, %s406_s7), 3  ;;  %vm281_vm0 = vcmask 261120   ;;  %s491_s16 = scalar_lea.hbm %s490_s22, 16 }
  0x14   : > { %248 = vmatpush.msra.mxu0 %v243_v0  ;;  %416 = vmatpush.msra.mxu2 %v243_v0  ;;  %v240_v3 = vld [vmem:[%s722_s1 + $0x60] sm:$0xff]  ;;  %v276_v4 = vld [vmem:[%s724_s3 + $0x18] sm:$0xff]  ;;  %v238_v6 = vld [vmem:[%s722_s1 + $0x50] sm:$0xff]  ;;  %s407_s23 = sshll.u32 %s734_s7, 3  ;;  %s218_s7 = scalar_lea.vmem [#allocation2], %s405_s8 }
  0x15   : > { %v239_v5 = vld [vmem:[%s722_s1 + $0x58] sm:$0xff]  ;;  %300 = vmatpush.msra.mxu1 %v276_v4  ;;  %v237_v7 = vld [vmem:[%s722_s1 + $0x48] sm:$0xff]  ;;  %v236_v8 = vld [vmem:[%s722_s1 + $0x40] sm:$0xff]  ;;  %s223_s10 = scalar_lea.vmem %s721_s0, %s407_s23  ;;  %s336_s13 = sshll.u32 %s218_s7, 4  ;;  %s337_s13 = int_to_ptr.vmem [resolvable:$true] %s336_s13 }
  0x16   : > { %249 = vmatpush.msra.mxu0 %v242_v1  ;;  %417 = vmatpush.msra.mxu2 %v242_v1  ;;  %v235_v9 = vld [vmem:[%s722_s1 + $0x38] sm:$0xff]  ;;  %v234_v10 = vld [vmem:[%s722_s1 + $0x30] sm:$0xff]  ;;  %v233_v11 = vld [vmem:[%s722_s1 + $0x28] sm:$0xff]  ;;  %p492_p11 = scmp.ne.s32.totalorder %s490_s22, %s491_s16  ;;  %p496_p0 = scmp.lt.s32.totalorder %s490_s22, %s726_s5 }
  0x17   : > { %v232_v12 = vld [vmem:[%s722_s1 + $0x20] sm:$0xff]  ;;  %v231_v13 = vld [vmem:[%s722_s1 + $0x18] sm:$0xff]  ;;  %v230_v14 = vld [vmem:[%s722_s1 + $0x10] sm:$0xff]  ;;  %p497_p1 = scmp.lt.s32.totalorder %s495_s25, %s491_s16 }
  0x18   : > { %250 = vmatpush.msra.mxu0 %v241_v2  ;;  %418 = vmatpush.msra.mxu2 %v241_v2  ;;  %v229_v15 = vld [vmem:[%s722_s1 + $0x8] sm:$0xff]  ;;  %v228_v16 = vld [vmem:[%s722_s1] sm:$0xff]  ;;  %v275_v19 = vld [vmem:[%s724_s3 + $0x10] sm:$0xff]  ;;  %p493_p12 = pnand %p492_p11, %p609_p5 }
  0x19   : > { %v226_v17 = vld [vmem:[%s223_s10] sm:$0xff]  ;;  %v227_v18 = vld [vmem:[%s223_s10 + $0x8] sm:$0xff]  ;;  %301 = vmatpush.msra.mxu1 %v275_v19  ;;  %p498_p2 = por %p497_p1, %p496_p0 }
  0x1a   : > { %251 = vmatpush.msra.mxu0 %v240_v3  ;;  %419 = vmatpush.msra.mxu2 %v240_v3  ;;  %v274_v20 = vld [vmem:[%s724_s3 + $0x8] sm:$0xff]  ;;  %v273_v21 = vld [vmem:[%s724_s3] sm:$0xff]  ;;  %p494_p13 = pneg %p493_p12 }
  0x1b   : > { %302 = vmatpush.msra.mxu1 %v274_v20  ;;  %v473_v22 = vld [vmem:[%s723_s2] ss:$0 sm:$0xff] }
  0x1c   : > { %252 = vmatpush.msra.mxu0 %v239_v5  ;;  %420 = vmatpush.msra.mxu2 %v239_v5  ;;  %v474_v29 = vld [vmem:[%s725_s4] ss:$0 sm:$0xff]  ;;  %p499_p3 = pnand %p498_p2, %p494_p13 }
  0x1d   : > { %303 = vmatpush.msra.mxu1 %v273_v21 }
  0x1e   : > { %253 = vmatpush.msra.mxu0 %v238_v6  ;;  %421 = vmatpush.msra.mxu2 %v238_v6 }
  0x20   : > { %254 = vmatpush.msra.mxu0 %v237_v7  ;;  %422 = vmatpush.msra.mxu2 %v237_v7 }
  0x22   : > { %255 = vmatpush.msra.mxu0 %v236_v8  ;;  %423 = vmatpush.msra.mxu2 %v236_v8 }
  0x24   : > { %256 = vmatpush.msra.mxu0 %v235_v9  ;;  %424 = vmatpush.msra.mxu2 %v235_v9 }
  0x26   : > { %257 = vmatpush.msra.mxu0 %v234_v10  ;;  %425 = vmatpush.msra.mxu2 %v234_v10 }
  0x28   : > { %258 = vmatpush.msra.mxu0 %v233_v11  ;;  %426 = vmatpush.msra.mxu2 %v233_v11 }
  0x2a   : > { %259 = vmatpush.msra.mxu0 %v232_v12  ;;  %427 = vmatpush.msra.mxu2 %v232_v12 }
  0x2c   : > { %260 = vmatpush.msra.mxu0 %v231_v13  ;;  %428 = vmatpush.msra.mxu2 %v231_v13 }
  0x2e   : > { %261 = vmatpush.msra.mxu0 %v230_v14  ;;  %429 = vmatpush.msra.mxu2 %v230_v14 }
  0x30   : > { %262 = vmatpush.msra.mxu0 %v229_v15  ;;  %430 = vmatpush.msra.mxu2 %v229_v15 }
  0x32   : > { %263 = vmatpush.msra.mxu0 %v228_v16  ;;  %431 = vmatpush.msra.mxu2 %v228_v16 }
  0x33   : > { %264 = vmatmul.f32.vlgmr.msra.gmra.mxu0 %v226_v17  ;;  %267 = vmatmul.f32.vlgmr.msra.gmra.mxu2 %v227_v18 }
  0xb0   : > { %v265_v23 = vpop.f32.mrf.mxu0 }
  0xb1   : > { %v266_v24 = vadd.f32 %v473_v22, %v265_v23 }
  0xb3   : > { %v271_v25 = vmax.f32 %v266_v24, 0.0 }
  0xb5   : > { %408 = vmatmul.msk.f32.vlgmr.msra.gmra.mxu1 %vm281_vm0, %v271_v25 }
  0xb6   : > { %v268_v26 = vpop.f32.mrf.mxu2 }
  0xb7   : > { %v269_v27 = vadd.f32 %v473_v22, %v268_v26 }
  0xb9   : > { %v272_v28 = vmax.f32 %v269_v27, 0.0 }
  0xbd   : > { %409 = vmatmul.msk.f32.gmra.mxu1 %vm281_vm0, %v272_v28 }
 0x132   : > { %v305_v30 = vpop.f32.mrf.mxu1 }
 0x133   : > { %v306_v31 = vadd.f32 %v474_v29, %v305_v30 }
 0x135   : > { %v311_v32 = vadd.f32 3.0, %v306_v31 }
 0x137   : > { %v313_v33 = vmax.f32 %v311_v32, 0.0 }
 0x139   : > { %v315_v34 = vmin.f32 %v313_v33, 6.0 }
 0x13a   : > { %v308_v35 = vpop.f32.mrf.mxu1 }
 0x13b   : > { %v317_v36 = vmul.f32 0.16666667, %v315_v34  ;;  %v309_v37 = vadd.f32 %v474_v29, %v308_v35 }
 0x13d   : > { %v319_v38 = vmul.f32 %v317_v36, %v226_v17  ;;  %v312_v39 = vadd.f32 3.0, %v309_v37 }
 0x13f   : > { %321 = vst [vmem:[%s218_s7] sm:$0xff] %v319_v38  ;;  %v314_v40 = vmax.f32 %v312_v39, 0.0 }
 0x141   : > { %v316_v41 = vmin.f32 %v314_v40, 6.0 }
 0x143   : > { %v318_v42 = vmul.f32 0.16666667, %v316_v41 }
 0x145   : > { %v320_v43 = vmul.f32 %v318_v42, %v227_v18 }
 0x147   : > { %322 = vst [vmem:[%s218_s7 + $0x8] sm:$0xff] %v320_v43 }
 0x148   : > { %502 = shalt.err (!%p499_p3)
}
 0x149   : > { %s539_s6 = smov 128   ;;  %s540_s8 = smov 8  }
 0x14a   : > { %432 = dma.vmem_to_hbm [thread:$0]  (%p609_p5), %s337_s13, 256, %s339_s14, %s324_s15, %s539_s6, %s539_s6, %s540_s8  }
 0x14b PF: > { %p438_p4 = scmp.ge.s32.totalorder %s537_s21, 2  ;;  %s353_s9 = sand.u32 1, %s525_s18  }
 0x14c   : > { %s354_s10 = scalar_lea.sflag [#allocation3], %s353_s9 }
 0x14d   : > { %p435_p7 = pnand %p438_p4, %p613_p6 }
 0x14f   : > { %p436_p8 = pneg %p435_p7 }
 0x151   : > { %520 = dma.done.wait (%p436_p8), %s354_s10, 256  }
 0x152   : > { %522 = vsyncadd (%p436_p8), %s354_s10, 4294967040  ;;  %p15_p9 = scmp.ge.s32.totalorder %s596_s24, 4   ;;  %s729_s18 = smov %s529_s19 }
 0x153   : > { %s730_s19 = smov %s533_s20  ;;  %s731_s20 = smov %s607_s27 }
 0x154   : > { %s732_s21 = smov %s596_s24  ;;  %17 = sbr.rel (!%p15_p9) target bundleno = 3 (0x3), region = 75 }
 0x159   :  { %360 = vsyncpa [#allocation3], 1 }
 0x15a   :  { %362 = vsyncpa [#allocation3 + $0x1], 1 }

</bundles_post_ra>
